<compile_context>
chip_gen: v7x
topology: tpu7x:2x2x1
jax: 0.10.0
libtpu: 0.0.40
codegen_flags: <defaults>
</compile_context>

<pallas_src>
import jax
import jax.numpy as jnp
from jax.experimental import pallas as pl
from jax.experimental.pallas import tpu as pltpu

N_BLOCKS = 5   # number of ResBlocks
KSIZE = 5      # conv kernel size inside a ResBlock
PAD = 2        # padding=2 -> "same" length


def _make_kernel(use_stacked_taps):
    """Build the kernel body; `use_stacked_taps` is a static (trace-time) switch."""

    def kernel(x_ref, w1_ref, b1_ref, wt_ref, bres_ref, wlin_ref, vmask_ref,
               sel_ref, blin_ref, o_ref, y_ref, hpad_ref):
        """Grid = (chunk i, ResBlock b).  One chunk packs Bc batch elements.

        x_ref    : (1, C, Pc)  bf16   packed one-hot/soft chars, Pc = Bc*(L+2*PAD)
        w1_ref   : (H, C)      bf16   1x1 conv weight
        b1_ref   : (H, 1)      f32
        wt_ref   : per-block conv weights (streamed along grid axis b), bf16:
                     stacked  : (1, 2, H, KSIZE*H)
                     per-tap  : (1, 2*KSIZE, H, H)
        bres_ref : (1, 2, H, 1) f32   per-block conv biases (streamed)
        wlin_ref : (H, S)      f32    linear weight tile (zeros on PAD columns)
        vmask_ref: (1, Pc)     f32    1.0 on valid columns, 0.0 on pad columns
        sel_ref  : (Pc, Bc)    f32    packed-column -> batch selector
        blin_ref : (1, 1)      f32    linear bias
        o_ref    : (1, 1, Bc)  f32    per-batch critic outputs
        y_ref    : (H, Pc)     f32    persistent residual activation (scratch)
        hpad_ref : (H, Pc+2*PAD) bf16 persistent zero-padded conv input (scratch)
        """
        H, Pc = y_ref.shape
        b = pl.program_id(1)

        # Zero only the 2*PAD edge strips (interior is fully overwritten each conv).
        # Done every step: scratch is per-core under "parallel" chunk sharding, so a
        # program_id==0 guard would be unsafe on v7x's two TensorCores.
        hpad_ref[:, :PAD] = jnp.zeros((H, PAD), hpad_ref.dtype)
        hpad_ref[:, Pc + PAD:Pc + 2 * PAD] = jnp.zeros((H, PAD), hpad_ref.dtype)

        vmask = vmask_ref[...]                                       # (1, Pc)

        @pl.when(b == 0)
        def _init():
            # conv1d(n_chars -> hidden, kernel 1): bf16 MXU matmul, f32 accumulate.
            y0 = jnp.dot(w1_ref[...], x_ref[0],
                         preferred_element_type=jnp.float32)
            y_ref[...] = (y0 + b1_ref[...]) * vmask                  # zero pad cols

        def conv5(c):
            """kernel-5 / pad-2 conv of the activation currently in hpad_ref."""
            if use_stacked_taps:
                # Small H (<128): one K=5H matmul for better MXU contraction
                # utilization (tap-stacked weight was prepared host-side).
                stacked = jnp.concatenate(
                    [hpad_ref[:, k:k + Pc] for k in range(KSIZE)], axis=0)
                acc = jnp.dot(wt_ref[0, c], stacked,
                              preferred_element_type=jnp.float32)
            else:
                # Large H: accumulate 5 K=H matmuls into f32 — same MXU FLOPs, no
                # (5H, Pc) transient pushed through the single vector-store slot.
                acc = jnp.dot(wt_ref[0, c * KSIZE], hpad_ref[:, 0:Pc],
                              preferred_element_type=jnp.float32)
                for k in range(1, KSIZE):
                    acc = acc + jnp.dot(wt_ref[0, c * KSIZE + k],
                                        hpad_ref[:, k:k + Pc],
                                        preferred_element_type=jnp.float32)
            return acc + bres_ref[0, c]

        # One ResBlock: y + 0.3 * conv5(relu(conv5(relu(y))))
        y = y_ref[...]
        hpad_ref[:, PAD:PAD + Pc] = jnp.maximum(y, 0.0).astype(hpad_ref.dtype)
        h = conv5(0)
        hpad_ref[:, PAD:PAD + Pc] = (jnp.maximum(h, 0.0) * vmask
                                     ).astype(hpad_ref.dtype)
        h = conv5(1)
        y = y + 0.3 * (h * vmask)                    # keep pad columns exactly zero
        y_ref[...] = y

        @pl.when(b == pl.num_programs(1) - 1)
        def _final():
            # linear(seq_len*hidden -> 1): broadcast the (H, S) weight tile across
            # the Bc packed segments (pad columns of y are zero so pad weights are
            # irrelevant), reduce over H, then a tiny selector matmul per batch.
            Bc = sel_ref.shape[1]
            wfull = jnp.concatenate([wlin_ref[...]] * Bc, axis=1)    # (H, Pc)
            z = jnp.sum(y * wfull, axis=0, keepdims=True)            # (1, Pc)
            o_ref[0] = (jnp.dot(z, sel_ref[...],
                                preferred_element_type=jnp.float32)
                        + blin_ref[...])

    return kernel


def discriminator_lang(x, params, *, num_chunks=1, use_stacked_taps=None):
    """x: (B, seq_len, n_chars) float32 -> (B, 1) float32.

    num_chunks: shard the batch into chunks along a "parallel" grid axis
    (use 2 on v7x so both TensorCores work; keep 1 on v5e/v6e).
    """
    w1, b1, wres, bres, wlin, blin = params
    B, L, C = x.shape
    H = w1.shape[0]
    S = L + 2 * PAD                               # per-batch packed segment width
    assert B % num_chunks == 0, "num_chunks must divide the batch"
    Bc = B // num_chunks
    Pc = Bc * S
    if use_stacked_taps is None:
        use_stacked_taps = H < 128                # small H: K=5H stacking wins

    f32, bf16 = jnp.float32, jnp.bfloat16

    # ---------------- layout glue (pure JAX, outside the kernel) ----------------
    # Lane-pack the batch with 2*PAD zero columns between segments; the gaps absorb
    # the conv reach so taps never cross batch elements.  Leading chunk axis keeps
    # every chunk-indexed block's last two dims equal to the full array dims.
    xt = jnp.transpose(x, (2, 0, 1))                                  # (C, B, L)
    x_packed = jnp.pad(xt, ((0, 0), (0, 0), (PAD, PAD)))              # (C, B, S)
    x_packed = jnp.transpose(x_packed.reshape(C, num_chunks, Pc),
                             (1, 0, 2)).astype(bf16)                  # (nc, C, Pc)

    if use_stacked_taps:
        # (H, 5H) per conv: taps stacked along the contraction dim (host-side).
        wt = jnp.transpose(wres, (0, 1, 3, 2, 4)).reshape(
            N_BLOCKS, 2, H, KSIZE * H).astype(bf16)
        wt_spec = pl.BlockSpec((1, 2, H, KSIZE * H), lambda i, b: (b, 0, 0, 0))
    else:
        # (H, H) per tap: kernel accumulates 5 K=H matmuls (no stacking copy).
        wt = wres.reshape(N_BLOCKS, 2 * KSIZE, H, H).astype(bf16)
        wt_spec = pl.BlockSpec((1, 2 * KSIZE, H, H), lambda i, b: (b, 0, 0, 0))

    bres_r = bres.reshape(N_BLOCKS, 2, H, 1).astype(f32)
    w1_r = w1.astype(bf16)
    b1_r = b1.reshape(H, 1).astype(f32)
    # Single (H, S) linear-weight tile (hidden-major flatten order of the PyTorch
    # view); broadcast across the Bc segments inside the kernel.
    wlin_s = jnp.pad(wlin, ((0, 0), (PAD, PAD))).astype(f32)          # (H, S)
    vmask = jnp.pad(jnp.ones((1, Bc, L), f32),
                    ((0, 0), (0, 0), (PAD, PAD))).reshape(1, Pc)      # chunk-invariant
    sel = jnp.repeat(jnp.eye(Bc, dtype=f32), S, axis=0)               # (Pc, Bc)
    blin_r = jnp.reshape(blin, (1, 1)).astype(f32)

    # Explicit VMEM budget: double-buffered inputs + output + persistent scratch,
    # with headroom for transients.  (If weights were NOT streamed per block, the
    # alternative would be pipeline_mode=pl.Buffered(1) on the constant inputs.)
    vmem_est = (2 * (C * Pc * 2                      # x (bf16)
                     + 2 * KSIZE * H * H * 2         # per-block conv weights (bf16)
                     + 2 * H * 4                     # per-block conv biases
                     + H * C * 2 + H * 4             # w1, b1
                     + H * S * 4 + Pc * 4            # wlin tile, vmask
                     + Pc * Bc * 4 + 4               # sel, blin
                     + Bc * 4)                       # output
                + H * Pc * 4                         # y scratch
                + H * (Pc + 2 * PAD) * 2             # hpad scratch
                + H * Pc * 4)                        # transient (wfull / stacked)
    vmem_limit = int(min(max(2 * vmem_est + (4 << 20), 32 << 20), 56 << 20))

    flops = num_chunks * (2 * H * C * Pc                              # 1x1 conv
                          + N_BLOCKS * 2 * (2 * KSIZE * H * H * Pc)   # res convs
                          + 2 * H * Pc + 2 * Pc * Bc)                 # linear head
    bytes_accessed = int(x_packed.size * 2 + num_chunks * wt.size * 2
                         + bres_r.size * 4 + w1_r.size * 2 + b1_r.size * 4
                         + wlin_s.size * 4 + vmask.size * 4 + sel.size * 4
                         + 4 + B * 4)

    out = pl.pallas_call(
        _make_kernel(use_stacked_taps),
        out_shape=jax.ShapeDtypeStruct((num_chunks, 1, Bc), f32),
        grid=(num_chunks, N_BLOCKS),
        in_specs=[
            pl.BlockSpec((1, C, Pc), lambda i, b: (i, 0, 0)),         # x (per chunk)
            pl.BlockSpec((H, C), lambda i, b: (0, 0)),                # w1
            pl.BlockSpec((H, 1), lambda i, b: (0, 0)),                # b1
            wt_spec,                                                  # conv W (per block)
            pl.BlockSpec((1, 2, H, 1), lambda i, b: (b, 0, 0, 0)),    # conv b (per block)
            pl.BlockSpec((H, S), lambda i, b: (0, 0)),                # linear weight tile
            pl.BlockSpec((1, Pc), lambda i, b: (0, 0)),               # valid-column mask
            pl.BlockSpec((Pc, Bc), lambda i, b: (0, 0)),              # batch selector
            pl.BlockSpec((1, 1), lambda i, b: (0, 0)),                # linear bias
        ],
        out_specs=pl.BlockSpec((1, 1, Bc), lambda i, b: (i, 0, 0)),
        scratch_shapes=[pltpu.VMEM((H, Pc), f32),                     # residual y
                        pltpu.VMEM((H, Pc + 2 * PAD), bf16)],         # padded conv input
        compiler_params=pltpu.CompilerParams(
            dimension_semantics=("parallel", "arbitrary"),
            vmem_limit_bytes=vmem_limit),
        cost_estimate=pl.CostEstimate(flops=flops, transcendentals=0,
                                      bytes_accessed=bytes_accessed),
    )(x_packed, w1_r, b1_r, wt, bres_r, wlin_s, vmask, sel, blin_r)

    return out.reshape(B, 1)


# ---------------- pure-JAX reference (for correctness check) ----------------
def _ref_conv5(h, w_taps, bias):
    # h: (B, H, L)
    _, _, L = h.shape
    hp = jnp.pad(h, ((0, 0), (0, 0), (PAD, PAD)))
    out = jnp.zeros_like(h) + bias[None, :, None]
    for k in range(KSIZE):
        out = out + jnp.einsum('oi,bil->bol', w_taps[k], hp[:, :, k:k + L])
    return out


def reference(x, params):
    w1, b1, wres, bres, wlin, blin = params
    xt = jnp.transpose(x, (0, 2, 1))                  # (B, C, L)
    y = jnp.einsum('hc,bcl->bhl', w1, xt) + b1[None, :, None]
    for blk in range(N_BLOCKS):
        h = jnp.maximum(y, 0.0)
        h = _ref_conv5(h, wres[blk, 0], bres[blk, 0])
        h = jnp.maximum(h, 0.0)
        h = _ref_conv5(h, wres[blk, 1], bres[blk, 1])
        y = y + 0.3 * h
    return jnp.einsum('bhl,hl->b', y, wlin)[:, None] + blin


if __name__ == "__main__":
    # Small shapes consistent with Discriminator_lang(n_chars, seq_len, batch, hidden)
    B, L, C, H = 2, 8, 4, 32      # batch=2, seq_len=8, n_chars=4, hidden=32

    key = jax.random.PRNGKey(0)
    ks = jax.random.split(key, 7)
    # Deterministic synthetic parameters (no checkpoint loading).
    w1 = jax.random.normal(ks[0], (H, C), jnp.float32) * (1.0 / C ** 0.5)
    b1 = jax.random.normal(ks[1], (H,), jnp.float32) * 0.05
    wres = jax.random.normal(ks[2], (N_BLOCKS, 2, KSIZE, H, H), jnp.float32) \
        * (0.3 / (KSIZE * H) ** 0.5)
    bres = jax.random.normal(ks[3], (N_BLOCKS, 2, H), jnp.float32) * 0.05
    wlin = jax.random.normal(ks[4], (H, L), jnp.float32) * (1.0 / (H * L) ** 0.5)
    blin = jnp.float32(0.1)
    x = jax.random.normal(ks[5], (B, L, C), jnp.float32)

    params = (w1, b1, wres, bres, wlin, blin)
    ref = reference(x, params)

    # Default path: 1 chunk, K=5H stacked conv (H < 128).
    out = jax.block_until_ready(discriminator_lang(x, params))
    assert out.shape == (B, 1), out.shape
    # bf16 matmuls with f32 accumulation -> small deviation vs f32 reference.
    assert jnp.allclose(out, ref, atol=3e-2, rtol=3e-2), (out, ref)

    # Also exercise the large-H tap-accumulation conv path and the chunked
    # ("parallel" across TensorCores on v7x) grid layout.
    out2 = jax.block_until_ready(
        discriminator_lang(x, params, num_chunks=2, use_stacked_taps=False))
    assert out2.shape == (B, 1), out2.shape
    assert jnp.allclose(out2, ref, atol=3e-2, rtol=3e-2), (out2, ref)

    print("KERNEL_OK")
</pallas_src>

<mosaic_0001>
module attributes {stable_mosaic.version = 11 : i64} {
  func.func @kernel(%arg0: i32, %arg1: i32, %arg2: memref<1x4x24xbf16, #tpu.memory_space<vmem>>, %arg3: memref<32x4xbf16, #tpu.memory_space<vmem>>, %arg4: memref<32x1xf32, #tpu.memory_space<vmem>>, %arg5: memref<1x2x32x160xbf16, #tpu.memory_space<vmem>>, %arg6: memref<1x2x32x1xf32, #tpu.memory_space<vmem>>, %arg7: memref<32x12xf32, #tpu.memory_space<vmem>>, %arg8: memref<1x24xf32, #tpu.memory_space<vmem>>, %arg9: memref<24x2xf32, #tpu.memory_space<vmem>>, %arg10: memref<1x1xf32, #tpu.memory_space<vmem>>, %arg11: memref<1x1x2xf32, #tpu.memory_space<vmem>>, %arg12: memref<32x24xf32, #tpu.memory_space<vmem>>, %arg13: memref<32x28xbf16, #tpu.memory_space<vmem>>) attributes {dimension_semantics = [#tpu.dimension_semantics<parallel>, #tpu.dimension_semantics<arbitrary>], iteration_bounds = array<i64: 1, 5>, scalar_prefetch = 0 : i64, scratch_operands = 2 : i64, tpu.core_type = #tpu.core_type<tc>, window_params = [{transform_indices = @transform_0, window_bounds = array<i64: 1, 4, 24>}, {pipeline_mode = #tpu.pipeline_mode<synchronous>, transform_indices = @transform_1, window_bounds = array<i64: 32, 4>}, {pipeline_mode = #tpu.pipeline_mode<synchronous>, transform_indices = @transform_2, window_bounds = array<i64: 32, 1>}, {transform_indices = @transform_3, window_bounds = array<i64: 1, 2, 32, 160>}, {transform_indices = @transform_4, window_bounds = array<i64: 1, 2, 32, 1>}, {pipeline_mode = #tpu.pipeline_mode<synchronous>, transform_indices = @transform_5, window_bounds = array<i64: 32, 12>}, {pipeline_mode = #tpu.pipeline_mode<synchronous>, transform_indices = @transform_6, window_bounds = array<i64: 1, 24>}, {pipeline_mode = #tpu.pipeline_mode<synchronous>, transform_indices = @transform_7, window_bounds = array<i64: 24, 2>}, {pipeline_mode = #tpu.pipeline_mode<synchronous>, transform_indices = @transform_8, window_bounds = array<i64: 1, 1>}, {transform_indices = @transform_9, window_bounds = array<i64: 1, 1, 2>}]} {
    %cst = arith.constant 0.000000e+00 : bf16
    %0 = vector.broadcast %cst : bf16 to vector<32x2xbf16>
    %c0 = arith.constant 0 : index
    %c0_0 = arith.constant 0 : index
    %1 = vector.load %arg13[%c0, %c0_0] : memref<32x28xbf16, #tpu.memory_space<vmem>>, vector<32x2xbf16>
    tpu.vector_store %arg13[%c0, %c0_0], %0 {strides = array<i32>} : memref<32x28xbf16, #tpu.memory_space<vmem>>, vector<32x2xbf16>,
    %cst_1 = arith.constant 0.000000e+00 : bf16
    %2 = vector.broadcast %cst_1 : bf16 to vector<32x2xbf16>
    %c0_2 = arith.constant 0 : index
    %c26 = arith.constant 26 : index
    %3 = vector.load %arg13[%c0_2, %c26] : memref<32x28xbf16, #tpu.memory_space<vmem>>, vector<32x2xbf16>
    tpu.vector_store %arg13[%c0_2, %c26], %2 {strides = array<i32>} : memref<32x28xbf16, #tpu.memory_space<vmem>>, vector<32x2xbf16>,
    %c0_3 = arith.constant 0 : index
    %c0_4 = arith.constant 0 : index
    %4 = vector.load %arg8[%c0_3, %c0_4] : memref<1x24xf32, #tpu.memory_space<vmem>>, vector<1x24xf32>
    %c0_i32 = arith.constant 0 : i32
    %5 = arith.cmpi eq, %arg1, %c0_i32 : i32
    %6 = arith.extui %5 : i1 to i32
    %c0_i32_5 = arith.constant 0 : i32
    %7 = arith.cmpi ne, %6, %c0_i32_5 : i32
    scf.if %7 {
      %c0_52 = arith.constant 0 : index
      %c0_53 = arith.constant 0 : index
      %54 = vector.load %arg3[%c0_52, %c0_53] : memref<32x4xbf16, #tpu.memory_space<vmem>>, vector<32x4xbf16>
      %c0_54 = arith.constant 0 : index
      %c0_55 = arith.constant 0 : index
      %c0_56 = arith.constant 0 : index
      %55 = vector.load %arg2[%c0_54, %c0_55, %c0_56] : memref<1x4x24xbf16, #tpu.memory_space<vmem>>, vector<1x4x24xbf16>
      %56 = vector.shape_cast %55 : vector<1x4x24xbf16> to vector<4x24xbf16>
      %cst_57 = arith.constant dense<0.000000e+00> : vector<32x24xf32>
      %57 = tpu.matmul %54, %56, %cst_57 {dimension_numbers = #tpu.dot_dimension_numbers<[1], [0], [0], [1], [0, 0, 1, 1], [], []>} : vector<32x4xbf16>, vector<4x24xbf16>, vector<32x24xf32> -> vector<32x24xf32>
      %c0_58 = arith.constant 0 : index
      %c0_59 = arith.constant 0 : index
      %58 = vector.load %arg4[%c0_58, %c0_59] : memref<32x1xf32, #tpu.memory_space<vmem>>, vector<32x1xf32>
      %59 = vector.broadcast %58 : vector<32x1xf32> to vector<32x24xf32>
      %60 = arith.addf %57, %59 : vector<32x24xf32>
      %61 = vector.broadcast %4 : vector<1x24xf32> to vector<32x24xf32>
      %62 = arith.mulf %60, %61 : vector<32x24xf32>
      %c0_60 = arith.constant 0 : index
      %c0_61 = arith.constant 0 : index
      %63 = vector.load %arg12[%c0_60, %c0_61] : memref<32x24xf32, #tpu.memory_space<vmem>>, vector<32x24xf32>
      tpu.vector_store %arg12[%c0_60, %c0_61], %62 {strides = array<i32>} : memref<32x24xf32, #tpu.memory_space<vmem>>, vector<32x24xf32>,
    } else {
    }
    %c0_6 = arith.constant 0 : index
    %c0_7 = arith.constant 0 : index
    %8 = vector.load %arg12[%c0_6, %c0_7] : memref<32x24xf32, #tpu.memory_space<vmem>>, vector<32x24xf32>
    %cst_8 = arith.constant 0.000000e+00 : f32
    %9 = vector.broadcast %cst_8 : f32 to vector<32x24xf32>
    %10 = arith.maximumf %8, %9 : vector<32x24xf32>
    %11 = arith.truncf %10 : vector<32x24xf32> to vector<32x24xbf16>
    %c0_9 = arith.constant 0 : index
    %c2 = arith.constant 2 : index
    %12 = vector.load %arg13[%c0_9, %c2] : memref<32x28xbf16, #tpu.memory_space<vmem>>, vector<32x24xbf16>
    tpu.vector_store %arg13[%c0_9, %c2], %11 {strides = array<i32>} : memref<32x28xbf16, #tpu.memory_space<vmem>>, vector<32x24xbf16>,
    %c0_10 = arith.constant 0 : index
    %c0_11 = arith.constant 0 : index
    %13 = vector.load %arg13[%c0_10, %c0_11] : memref<32x28xbf16, #tpu.memory_space<vmem>>, vector<32x24xbf16>
    %c0_12 = arith.constant 0 : index
    %c1 = arith.constant 1 : index
    %14 = vector.load %arg13[%c0_12, %c1] : memref<32x28xbf16, #tpu.memory_space<vmem>>, vector<32x24xbf16>
    %c0_13 = arith.constant 0 : index
    %c2_14 = arith.constant 2 : index
    %15 = vector.load %arg13[%c0_13, %c2_14] : memref<32x28xbf16, #tpu.memory_space<vmem>>, vector<32x24xbf16>
    %c0_15 = arith.constant 0 : index
    %c3 = arith.constant 3 : index
    %16 = vector.load %arg13[%c0_15, %c3] : memref<32x28xbf16, #tpu.memory_space<vmem>>, vector<32x24xbf16>
    %c0_16 = arith.constant 0 : index
    %c4 = arith.constant 4 : index
    %17 = vector.load %arg13[%c0_16, %c4] : memref<32x28xbf16, #tpu.memory_space<vmem>>, vector<32x24xbf16>
    %18 = tpu.concatenate %13, %14, %15, %16, %17 in 0 : vector<32x24xbf16>, vector<32x24xbf16>, vector<32x24xbf16>, vector<32x24xbf16>, vector<32x24xbf16> -> vector<160x24xbf16>
    %c0_17 = arith.constant 0 : index
    %c0_18 = arith.constant 0 : index
    %c0_19 = arith.constant 0 : index
    %c0_20 = arith.constant 0 : index
    %19 = vector.load %arg5[%c0_17, %c0_18, %c0_19, %c0_20] : memref<1x2x32x160xbf16, #tpu.memory_space<vmem>>, vector<1x1x32x160xbf16>
    %20 = vector.shape_cast %19 : vector<1x1x32x160xbf16> to vector<32x160xbf16>
    %cst_21 = arith.constant dense<0.000000e+00> : vector<32x24xf32>
    %21 = tpu.matmul %20, %18, %cst_21 {dimension_numbers = #tpu.dot_dimension_numbers<[1], [0], [0], [1], [0, 0, 1, 1], [], []>} : vector<32x160xbf16>, vector<160x24xbf16>, vector<32x24xf32> -> vector<32x24xf32>
    %c0_22 = arith.constant 0 : index
    %c0_23 = arith.constant 0 : index
    %c0_24 = arith.constant 0 : index
    %c0_25 = arith.constant 0 : index
    %22 = vector.load %arg6[%c0_22, %c0_23, %c0_24, %c0_25] : memref<1x2x32x1xf32, #tpu.memory_space<vmem>>, vector<1x1x32x1xf32>
    %23 = vector.shape_cast %22 : vector<1x1x32x1xf32> to vector<32x1xf32>
    %24 = vector.broadcast %23 : vector<32x1xf32> to vector<32x24xf32>
    %25 = arith.addf %21, %24 : vector<32x24xf32>
    %cst_26 = arith.constant 0.000000e+00 : f32
    %26 = vector.broadcast %cst_26 : f32 to vector<32x24xf32>
    %27 = arith.maximumf %25, %26 : vector<32x24xf32>
    %28 = vector.broadcast %4 : vector<1x24xf32> to vector<32x24xf32>
    %29 = arith.mulf %27, %28 : vector<32x24xf32>
    %30 = arith.truncf %29 : vector<32x24xf32> to vector<32x24xbf16>
    %c0_27 = arith.constant 0 : index
    %c2_28 = arith.constant 2 : index
    %31 = vector.load %arg13[%c0_27, %c2_28] : memref<32x28xbf16, #tpu.memory_space<vmem>>, vector<32x24xbf16>
    tpu.vector_store %arg13[%c0_27, %c2_28], %30 {strides = array<i32>} : memref<32x28xbf16, #tpu.memory_space<vmem>>, vector<32x24xbf16>,
    %c0_29 = arith.constant 0 : index
    %c0_30 = arith.constant 0 : index
    %32 = vector.load %arg13[%c0_29, %c0_30] : memref<32x28xbf16, #tpu.memory_space<vmem>>, vector<32x24xbf16>
    %c0_31 = arith.constant 0 : index
    %c1_32 = arith.constant 1 : index
    %33 = vector.load %arg13[%c0_31, %c1_32] : memref<32x28xbf16, #tpu.memory_space<vmem>>, vector<32x24xbf16>
    %c0_33 = arith.constant 0 : index
    %c2_34 = arith.constant 2 : index
    %34 = vector.load %arg13[%c0_33, %c2_34] : memref<32x28xbf16, #tpu.memory_space<vmem>>, vector<32x24xbf16>
    %c0_35 = arith.constant 0 : index
    %c3_36 = arith.constant 3 : index
    %35 = vector.load %arg13[%c0_35, %c3_36] : memref<32x28xbf16, #tpu.memory_space<vmem>>, vector<32x24xbf16>
    %c0_37 = arith.constant 0 : index
    %c4_38 = arith.constant 4 : index
    %36 = vector.load %arg13[%c0_37, %c4_38] : memref<32x28xbf16, #tpu.memory_space<vmem>>, vector<32x24xbf16>
    %37 = tpu.concatenate %32, %33, %34, %35, %36 in 0 : vector<32x24xbf16>, vector<32x24xbf16>, vector<32x24xbf16>, vector<32x24xbf16>, vector<32x24xbf16> -> vector<160x24xbf16>
    %c0_39 = arith.constant 0 : index
    %c1_40 = arith.constant 1 : index
    %c0_41 = arith.constant 0 : index
    %c0_42 = arith.constant 0 : index
    %38 = vector.load %arg5[%c0_39, %c1_40, %c0_41, %c0_42] : memref<1x2x32x160xbf16, #tpu.memory_space<vmem>>, vector<1x1x32x160xbf16>
    %39 = vector.shape_cast %38 : vector<1x1x32x160xbf16> to vector<32x160xbf16>
    %cst_43 = arith.constant dense<0.000000e+00> : vector<32x24xf32>
    %40 = tpu.matmul %39, %37, %cst_43 {dimension_numbers = #tpu.dot_dimension_numbers<[1], [0], [0], [1], [0, 0, 1, 1], [], []>} : vector<32x160xbf16>, vector<160x24xbf16>, vector<32x24xf32> -> vector<32x24xf32>
    %c0_44 = arith.constant 0 : index
    %c1_45 = arith.constant 1 : index
    %c0_46 = arith.constant 0 : index
    %c0_47 = arith.constant 0 : index
    %41 = vector.load %arg6[%c0_44, %c1_45, %c0_46, %c0_47] : memref<1x2x32x1xf32, #tpu.memory_space<vmem>>, vector<1x1x32x1xf32>
    %42 = vector.shape_cast %41 : vector<1x1x32x1xf32> to vector<32x1xf32>
    %43 = vector.broadcast %42 : vector<32x1xf32> to vector<32x24xf32>
    %44 = arith.addf %40, %43 : vector<32x24xf32>
    %45 = vector.broadcast %4 : vector<1x24xf32> to vector<32x24xf32>
    %46 = arith.mulf %44, %45 : vector<32x24xf32>
    %cst_48 = arith.constant 3.000000e-01 : f32
    %47 = vector.broadcast %cst_48 : f32 to vector<32x24xf32>
    %48 = arith.mulf %47, %46 : vector<32x24xf32>
    %49 = arith.addf %8, %48 : vector<32x24xf32>
    %c0_49 = arith.constant 0 : index
    %c0_50 = arith.constant 0 : index
    %50 = vector.load %arg12[%c0_49, %c0_50] : memref<32x24xf32, #tpu.memory_space<vmem>>, vector<32x24xf32>
    tpu.vector_store %arg12[%c0_49, %c0_50], %49 {strides = array<i32>} : memref<32x24xf32, #tpu.memory_space<vmem>>, vector<32x24xf32>,
    %c4_i32 = arith.constant 4 : i32
    %51 = arith.cmpi eq, %arg1, %c4_i32 : i32
    %52 = arith.extui %51 : i1 to i32
    %c0_i32_51 = arith.constant 0 : i32
    %53 = arith.cmpi ne, %52, %c0_i32_51 : i32
    scf.if %53 {
      %c0_52 = arith.constant 0 : index
      %c0_53 = arith.constant 0 : index
      %54 = vector.load %arg7[%c0_52, %c0_53] : memref<32x12xf32, #tpu.memory_space<vmem>>, vector<32x12xf32>
      %55 = tpu.concatenate %54, %54 in 1 : vector<32x12xf32>, vector<32x12xf32> -> vector<32x24xf32>
      %56 = arith.mulf %49, %55 : vector<32x24xf32>
      %cst_54 = arith.constant dense<0.000000e+00> : vector<24xf32>
      %57 = vector.multi_reduction <add>, %56, %cst_54 [0] : vector<32x24xf32> to vector<24xf32>
      %58 = vector.shape_cast %57 : vector<24xf32> to vector<1x24xf32>
      %c0_55 = arith.constant 0 : index
      %c0_56 = arith.constant 0 : index
      %59 = vector.load %arg9[%c0_55, %c0_56] : memref<24x2xf32, #tpu.memory_space<vmem>>, vector<24x2xf32>
      %cst_57 = arith.constant dense<0.000000e+00> : vector<1x2xf32>
      %60 = tpu.matmul %58, %59, %cst_57 {dimension_numbers = #tpu.dot_dimension_numbers<[1], [0], [0], [1], [0, 0, 1, 1], [], []>} : vector<1x24xf32>, vector<24x2xf32>, vector<1x2xf32> -> vector<1x2xf32>
      %c0_58 = arith.constant 0 : index
      %c0_59 = arith.constant 0 : index
      %61 = vector.load %arg10[%c0_58, %c0_59] : memref<1x1xf32, #tpu.memory_space<vmem>>, vector<1x1xf32>
      %62 = vector.broadcast %61 : vector<1x1xf32> to vector<1x2xf32>
      %63 = arith.addf %60, %62 : vector<1x2xf32>
      %c0_60 = arith.constant 0 : index
      %c0_61 = arith.constant 0 : index
      %c0_62 = arith.constant 0 : index
      %64 = vector.load %arg11[%c0_60, %c0_61, %c0_62] : memref<1x1x2xf32, #tpu.memory_space<vmem>>, vector<1x1x2xf32>
      %65 = vector.shape_cast %64 : vector<1x1x2xf32> to vector<1x2xf32>
      %66 = vector.shape_cast %63 : vector<1x2xf32> to vector<1x1x2xf32>
      tpu.vector_store %arg11[%c0_60, %c0_61, %c0_62], %66 {strides = array<i32>} : memref<1x1x2xf32, #tpu.memory_space<vmem>>, vector<1x1x2xf32>,
    } else {
    }
    return
  }
  func.func @transform_0(%arg0: i32, %arg1: i32) -> (i32, i32, i32) {
    %c0_i32 = arith.constant 0 : i32
    %c0_i32_0 = arith.constant 0 : i32
    %c0_i32_1 = arith.constant 0 : i32
    return %arg0, %c0_i32, %c0_i32_0 : i32, i32, i32
  }
  func.func @transform_1(%arg0: i32, %arg1: i32) -> (i32, i32) {
    %c0_i32 = arith.constant 0 : i32
    %c0_i32_0 = arith.constant 0 : i32
    %c0_i32_1 = arith.constant 0 : i32
    return %c0_i32, %c0_i32_0 : i32, i32
  }
  func.func @transform_2(%arg0: i32, %arg1: i32) -> (i32, i32) {
    %c0_i32 = arith.constant 0 : i32
    %c0_i32_0 = arith.constant 0 : i32
    %c0_i32_1 = arith.constant 0 : i32
    return %c0_i32, %c0_i32_0 : i32, i32
  }
  func.func @transform_3(%arg0: i32, %arg1: i32) -> (i32, i32, i32, i32) {
    %c0_i32 = arith.constant 0 : i32
    %c0_i32_0 = arith.constant 0 : i32
    %c0_i32_1 = arith.constant 0 : i32
    %c0_i32_2 = arith.constant 0 : i32
    return %arg1, %c0_i32, %c0_i32_0, %c0_i32_1 : i32, i32, i32, i32
  }
  func.func @transform_4(%arg0: i32, %arg1: i32) -> (i32, i32, i32, i32) {
    %c0_i32 = arith.constant 0 : i32
    %c0_i32_0 = arith.constant 0 : i32
    %c0_i32_1 = arith.constant 0 : i32
    %c0_i32_2 = arith.constant 0 : i32
    return %arg1, %c0_i32, %c0_i32_0, %c0_i32_1 : i32, i32, i32, i32
  }
  func.func @transform_5(%arg0: i32, %arg1: i32) -> (i32, i32) {
    %c0_i32 = arith.constant 0 : i32
    %c0_i32_0 = arith.constant 0 : i32
    %c0_i32_1 = arith.constant 0 : i32
    return %c0_i32, %c0_i32_0 : i32, i32
  }
  func.func @transform_6(%arg0: i32, %arg1: i32) -> (i32, i32) {
    %c0_i32 = arith.constant 0 : i32
    %c0_i32_0 = arith.constant 0 : i32
    %c0_i32_1 = arith.constant 0 : i32
    return %c0_i32, %c0_i32_0 : i32, i32
  }
  func.func @transform_7(%arg0: i32, %arg1: i32) -> (i32, i32) {
    %c0_i32 = arith.constant 0 : i32
    %c0_i32_0 = arith.constant 0 : i32
    %c0_i32_1 = arith.constant 0 : i32
    return %c0_i32, %c0_i32_0 : i32, i32
  }
  func.func @transform_8(%arg0: i32, %arg1: i32) -> (i32, i32) {
    %c0_i32 = arith.constant 0 : i32
    %c0_i32_0 = arith.constant 0 : i32
    %c0_i32_1 = arith.constant 0 : i32
    return %c0_i32, %c0_i32_0 : i32, i32
  }
  func.func @transform_9(%arg0: i32, %arg1: i32) -> (i32, i32, i32) {
    %c0_i32 = arith.constant 0 : i32
    %c0_i32_0 = arith.constant 0 : i32
    %c0_i32_1 = arith.constant 0 : i32
    return %arg0, %c0_i32, %c0_i32_0 : i32, i32, i32
  }
}

</mosaic_0001>

<bundles_post_ra>
// kernel: tpu_custom_call.1
= control target key start
LH: loop header
LB: loop body
LE: loop exit
PB: predicated region body
PF: predicated region fallthrough
CT: control target
= control target key end

     0   :  { %s1529_s0 = inlined_call_operand.vmem [shape: bf16[1,4,24], index: 0, kind: input, shape index: {}]   ;;  %s1530_s1 = inlined_call_operand.vmem [shape: bf16[32,4], index: 1, kind: input, shape index: {}]   ;;  %s1531_s2 = inlined_call_operand.vmem [shape: f32[32,1], index: 2, kind: input, shape index: {}]   ;;  %s1532_s3 = inlined_call_operand.vmem [shape: bf16[5,2,32,160], index: 3, kind: input, shape index: {}]   ;;  %s1533_s4 = inlined_call_operand.vmem [shape: f32[5,2,32,1], index: 4, kind: input, shape index: {}]   ;;  %s1534_s5 = inlined_call_operand.vmem [shape: f32[32,12], index: 5, kind: input, shape index: {}]   ;;  %s1535_s6 = inlined_call_operand.vmem [shape: f32[1,24], index: 6, kind: input, shape index: {}]   ;;  %s1536_s7 = inlined_call_operand.vmem [shape: f32[24,2], index: 7, kind: input, shape index: {}]   ;;  %s1537_s8 = inlined_call_operand.<no memory space> [shape: f32[1,1], index: 8, kind: input, shape index: {}]   ;;  %s1538_s9 = inlined_call_operand.hbm [shape: f32[1,1,2], index: 9, kind: output, shape index: {}]  }
   0x1   :  { %v14_v0 = vstv %s1537_s8 }
   0x2   :  { %15 = vst [vmem:[#allocation4] sm:$0x1] %v14_v0 }
   0x3   :  { %16 = vsyncpa [#allocation6], 0  ;;  %s1296_s11 = smov 0   ;;  %s1298_s12 = smov 0  }
   0x4   :  { %s1300_s13 = smov 0  }
   0x5 LB: > { %s1046_s8 = sadd.s32 4294967295, %s1228_s13   ;;  %s31_s14 = sadd.s32 1, %s1224_s12  ;;  %s1228_s13 = sphi %s1300_s13, %s22_s13   ;;  %s1224_s12 = sphi %s1298_s12, %s1541_s12   ;;  %s1220_s11 = sphi %s1296_s11, %s1540_s11  }
   0x6   : > { %p32_p0 = scmp.ge.s32.totalorder %s31_s14, 5  ;;  %p1050_p1 = scmp.ge.s32.totalorder %s1228_s13, 1 }
   0x7   : > { %p321_p2 = scmp.lt.s32.totalorder %s1228_s13, 6 }
   0x8   : > { %s1543_s14 = smov (%p32_p0, %s31_s14), 0 }
   0x9   : > { %p322_p3 = pnand %p1050_p1, %p321_p2 }
   0xa   : > { %p365_p4 = scmp.lt.s32.totalorder (!%p322_p3), %s1220_s11, 4  ;;  %vm376_vm0 = vcmask (!%p322_p3), 15360   ;;  %v1321_v1 = vld [vmem:[%s1535_s6] sm:$0x1] (!%p322_p3)  ;;  %vm379_vm1 = vcmask (!%p322_p3), 228560   ;;  %v1230_v2 = vmov (!%p322_p3), 0  }
   0xb   : > { %325 = sbr.rel (%p322_p3) target bundleno = 1623 (0x657), region = 56  ;;  %377 = vst.msk [vmem:[#allocation3] sm:$0xff] (!%p322_p3), %vm376_vm0, %v1230_v2  ;;  %378 = vst.msk [vmem:[#allocation3 + $0x8] sm:$0xff] (!%p322_p3), %vm376_vm0, %v1230_v2  ;;  %p1055_p5 = scmp.ne.s32.totalorder (!%p322_p3), %s1220_s11, 0 }
   0xc   : > { %380 = vst.msk [vmem:[#allocation3] sm:$0xff] (!%p322_p3), %vm379_vm1, %v1230_v2  ;;  %381 = vst.msk [vmem:[#allocation3 + $0x8] sm:$0xff] (!%p322_p3), %vm379_vm1, %v1230_v2 }
  0x12   : > { %s366_s17 = scalar_select %p365_p4, %s1220_s11, 4 }
  0x13   : > { %386 = sbr.rel (%p1055_p5) target bundleno = 244 (0xf4), region = 60  ;;  %v391_v3 = vld [vmem:[%s1529_s0] sm:$0x3] (!%p1055_p5)  ;;  %vm433_vm2 = vcmask (!%p1055_p5), 1041408   ;;  %vm426_vm3 = vcmask (!%p1055_p5), 31744   ;;  %v1160_v6 = vld [vmem:[%s1530_s1 + $0x8] sm:$0xff] (!%p1055_p5)   ;;  %v487_v12 = vlaneseq (!%p1055_p5) }
  0x14   : > { %s1086_s18 = sshll.u32 %s366_s17, 6  ;;  %v1159_v4 = vld [vmem:[%s1530_s1] sm:$0xff] (!%p1055_p5)   ;;  %1113 = vmatprep.subr.msk.bf16.mxu0 (!%p1055_p5), %vm433_vm2, %v391_v3  ;;  %v435_v5 = vsel (!%p1055_p5), %vm433_vm2, %v391_v3, 0  ;;  %v394_v7 = vld [vmem:[%s1531_s2 + $0x10] sm:$0xff] (!%p1055_p5)  ;;  %v1231_v8 = vmov (!%p1055_p5), 0   ;;  %v395_v10 = vld [vmem:[%s1531_s2 + $0x18] sm:$0xff] (!%p1055_p5) }
  0x15   : > { %s1331_s21 = scalar_lea.vmem %s1532_s3, %s1086_s18  ;;  %s1336_s24 = scalar_lea.vmem %s1533_s4, %s1086_s18  ;;  %1096 = vmatpush3.bf16.msra.mxu0 (!%p1055_p5), %v435_v5  ;;  %1097 = vmatprep.mubr.msk.bf16.mxu0 (!%p1055_p5), %vm426_vm3, %v1159_v4  ;;  %v392_v9 = vld [vmem:[%s1531_s2] sm:$0xff] (!%p1055_p5)  ;;  %v393_v11 = vld [vmem:[%s1531_s2 + $0x8] sm:$0xff] (!%p1055_p5)  ;;  %v488_v13 = vshrl.u32 (!%p1055_p5), %v487_v12, 7  ;;  %vm496_vm4 = vcmask (!%p1055_p5), 195584  }
  0x16   : > { %1158 = vset.pattern.permute.xlu1 (!%p1055_p5), %v1231_v8  ;;  %1157 = vset.pattern.permute.xlu0 (!%p1055_p5), %v1231_v8 }
  0x17   : > { %408 = vperm.xlu1 (!%p1055_p5), %1158, %v394_v7   ;;  %398 = vperm.xlu0 (!%p1055_p5), %1157, %v392_v9   ;;  %v489_v14 = vsub.s32 (!%p1055_p5), 0, %v488_v13 }
  0x18   : > { %1098 = vmatmul.mubr.msk.bf16.vlgmr.msra.gmra.mrb[0].mxu0 (!%p1055_p5), %vm426_vm3, %v1160_v6 }
  0x19   : > { %v490_v17 = vrot.slane (!%p1055_p5), %v1321_v1, %v489_v14 }
  0x1b   : > { %413 = vperm.xlu1 %1158, %v395_v10   ;;  %403 = vperm.xlu0 %1157, %v393_v11  }
  0x96   : > { %v409_v15 = vpop.permute.xlu1 %408  ;;  %v399_v16 = vpop.permute.xlu0 %398 }
  0x9a   : > { %v414_v21 = vpop.permute.xlu1 %413  ;;  %v404_v24 = vpop.permute.xlu0 %403 }
  0xeb   : > { %v1099_v18 = vpop.f32.mrb[0].mxu0 }
  0xec   : > { %v480_v19 = vadd.f32 %v1099_v18, %v409_v15  ;;  %v471_v20 = vpop.f32.mrb[1].mxu0 }
  0xed   : > { %v472_v22 = vadd.f32 %v471_v20, %v399_v16  ;;  %v1100_v23 = vpop.f32.mrb[2].mxu0 }
  0xee   : > { %v494_v25 = vmul.f32 %v490_v17, %v480_v19  ;;  %v483_v26 = vadd.f32 %v1100_v23, %v414_v21  ;;  %v474_v27 = vpop.f32.mrb[3].mxu0 }
  0xef   : > { %v492_v28 = vmul.f32 %v490_v17, %v472_v22  ;;  %v475_v29 = vadd.f32 %v474_v27, %v404_v24 }
  0xf0   : > { %499 = vst.msk [vmem:[#allocation2 + $0x10] sm:$0xff] %vm496_vm4, %v494_v25  ;;  %v495_v30 = vmul.f32 %v490_v17, %v483_v26 }
  0xf1   : > { %497 = vst.msk [vmem:[#allocation2] sm:$0xff] %vm496_vm4, %v492_v28  ;;  %v493_v31 = vmul.f32 %v490_v17, %v475_v29 }
  0xf2   : > { %500 = vst.msk [vmem:[#allocation2 + $0x18] sm:$0xff] %vm496_vm4, %v495_v30 }
  0xf3   : > { %498 = vst.msk [vmem:[#allocation2 + $0x8] sm:$0xff] %vm496_vm4, %v493_v31 }
  0xf4 PF: > { %603 = vmatprep.subr.bf16.mxu0 %v1230_v2  ;;  %1161 = vset.pattern.permute.xlu0 %v1230_v2  ;;  %s1232_s23 = smov 2   ;;  %vm519_vm5 = vcmask 211984   ;;  %s1233_s25 = smov 126   ;;  %v1165_v46 = vld [vmem:[%s1331_s21 + $0x4] ss:$8 sps:$4 sm:$0xff]   ;;  %vm596_vm6 = vcmask 261120   ;;  %v657_v62 = vlaneseq }
  0xf5   : > { %1162 = vset.pattern.permute.xlu1 %v1230_v2  ;;  %760 = vmatprep.subr.bf16.mxu1 %v1230_v2  ;;  %s1234_s26 = smov 127   ;;  %s1235_s27 = smov 125   ;;  %v554_v47 = vld [vmem:[%s1336_s24] sm:$0xff]  ;;  %v555_v48 = vld [vmem:[%s1336_s24 + $0x8] sm:$0xff]  ;;  %v557_v49 = vld [vmem:[%s1336_s24 + $0x18] sm:$0xff]  ;;  %vm821_vm7 = vcmask 195584  }
  0xf6   : > { %s1236_s28 = smov 124   ;;  %1064 = vmatprep.mubr.msk.bf16.mxu0 %vm596_vm6, %v1165_v46  ;;  %v556_v50 = vld [vmem:[%s1336_s24 + $0x10] sm:$0xff]  ;;  %v1163_v59 = vld [vmem:[%s1331_s21] ss:$8 sps:$4 sm:$0xff]   ;;  %v1408_v63 = vshrl.u32 %v657_v62, 7  ;;  %p1080_p6 = scmp.ne.s32.totalorder %s1220_s11, 4 }
  0xf7   : > { %v1365_v34 = vld [vmem:[#allocation2 + $0x10] sm:$0xff]  ;;  %s1237_s10 = smov (!%p1080_p6), 12   ;;  %vm1239_vm8 = vmmov (!%p1080_p6), 0   ;;  %vm850_vm9 = vcmask (!%p1080_p6), 97280   ;;  %vm958_vm10 = vcmask (!%p1080_p6), 8192  }
  0xf8   : > { %v1361_v32 = vld [vmem:[#allocation2] sm:$0xff]  ;;  %v507_v38 = vmax.f32 %v1365_v34, 0.0  ;;  %v1166_v60 = vld [vmem:[%s1331_s21 + $0x14] ss:$8 sps:$4 sm:$0xff]   ;;  %v1168_v61 = vld [vmem:[%s1331_s21 + $0x10] ss:$8 sps:$4 sm:$0xff]  }
  0xf9   : > { %v505_v35 = vmax.f32 %v1361_v32, 0.0  ;;  %v1371_v37 = vld [vmem:[#allocation2 + $0x18] sm:$0xff]  ;;  %v659_v3 = vsub.s32 0, %v1408_v63 }
  0xfa   : > { %v1363_v33 = vld [vmem:[#allocation2 + $0x8] sm:$0xff]  ;;  %v508_v39 = vmax.f32 %v1371_v37, 0.0 }
  0xfb   : > { %v506_v36 = vmax.f32 %v1363_v33, 0.0  ;;  %v1414_v9 = vrot.slane %v1321_v1, %v659_v3 }
  0xfc   : > { %v510_v41 = vpack.c.bf16 %v508_v39, %v507_v38  ;;  %v1072_v38 = vld [vmem:[%s1336_s24 + $0x30] sm:$0xff]  ;;  %v1171_v39 = vld [vmem:[%s1331_s21 + $0x24] ss:$8 sps:$4 sm:$0xff]  }
  0xfd   : > { %v509_v40 = vpack.c.bf16 %v506_v36, %v505_v35  ;;  %v1070_v36 = vld [vmem:[%s1336_s24 + $0x20] sm:$0xff]  ;;  %1078 = vmatprep.mubr.msk.bf16.mxu1 %vm596_vm6, %v1171_v39 }
  0xff   : > { %513 = vrot.lane.b32.xlu0 %v509_v40, %s1232_s23  ;;  %v1071_v40 = vld [vmem:[%s1336_s24 + $0x28] sm:$0xff] }
 0x103   : > { %515 = vrot.lane.b32.xlu0 %v510_v41, %s1232_s23  ;;  %v1073_v41 = vld [vmem:[%s1336_s24 + $0x38] sm:$0xff] }
 0x171   : > { %v514_v42 = vpop.permute.xlu0 %513 }
 0x172   : > { %520 = vst.msk [vmem:[#allocation3] sm:$0xff] %vm519_vm5, %v514_v42 }
 0x175   : > { %v516_v43 = vpop.permute.xlu0 %515 }
 0x176   : > { %521 = vst.msk [vmem:[#allocation3 + $0x8] sm:$0xff] %vm519_vm5, %v516_v43 }
 0x179   : > { %v522_v44 = vld [vmem:[#allocation3] sm:$0xff] }
 0x17a   : > { %532 = vrot.lane.b32.xlu0 %v522_v44, %s1233_s25  ;;  %526 = vrot.lane.b32.xlu1 %v522_v44, %s1234_s26 }
 0x17b   : > { %604 = vmatpush1.bf16.msra.mxu0 %v522_v44 }
 0x17c   : > { %605 = vmatprep.subr.bf16.mxu0 %v1230_v2 }
 0x17d   : > { %v523_v45 = vld [vmem:[#allocation3 + $0x8] sm:$0xff] }
 0x17e   : > { %538 = vrot.lane.b32.xlu0 %v522_v44, %s1235_s27  ;;  %528 = vrot.lane.b32.xlu1 %v523_v45, %s1234_s26 }
 0x17f   : > { %606 = vmatpush1.bf16.msra.mxu0 %v523_v45 }
 0x180   : > { %607 = vmatprep.subr.bf16.mxu0 %v1230_v2 }
 0x182   : > { %544 = vrot.lane.b32.xlu0 %v522_v44, %s1236_s28  ;;  %534 = vrot.lane.b32.xlu1 %v523_v45, %s1233_s25 }
 0x186   : > { %540 = vrot.lane.b32.xlu1 %v523_v45, %s1235_s27  ;;  %560 = vperm.xlu0 %1161, %v554_v47  }
 0x18a   : > { %546 = vrot.lane.b32.xlu1 %v523_v45, %s1236_s28  ;;  %575 = vperm.xlu0 %1161, %v557_v49  }
 0x18e   : > { %565 = vperm.xlu1 %1162, %v555_v48  }
 0x192   : > { %570 = vperm.xlu1 %1162, %v556_v50   ;;  %v1169_v50 = vld [vmem:[%s1331_s21 + $0x20] ss:$8 sps:$4 sm:$0xff]  }
 0x1ec   : > { %v527_v51 = vpop.permute.xlu1 %526  ;;  %v533_v53 = vpop.permute.xlu0 %532 }
 0x1ed   : > { %608 = vmatpush1.bf16.msra.mxu0 %v527_v51  ;;  %v1172_v51 = vld [vmem:[%s1331_s21 + $0x34] ss:$8 sps:$4 sm:$0xff]  }
 0x1ee   : > { %609 = vmatprep.subr.bf16.mxu0 %v1230_v2 }
 0x1f0   : > { %v529_v52 = vpop.permute.xlu1 %528  ;;  %v539_v55 = vpop.permute.xlu0 %538 }
 0x1f1   : > { %610 = vmatpush1.bf16.msra.mxu0 %v529_v52  ;;  %v1174_v52 = vld [vmem:[%s1331_s21 + $0x30] ss:$8 sps:$4 sm:$0xff]  }
 0x1f2   : > { %611 = vmatprep.subr.bf16.mxu0 %v1230_v2 }
 0x1f4   : > { %v535_v54 = vpop.permute.xlu1 %534  ;;  %v545_v57 = vpop.permute.xlu0 %544 }
 0x1f5   : > { %612 = vmatpush1.bf16.msra.mxu0 %v533_v53 }
 0x1f6   : > { %613 = vmatprep.subr.bf16.mxu0 %v1230_v2 }
 0x1f8   : > { %v541_v56 = vpop.permute.xlu1 %540 }
 0x1f9   : > { %614 = vmatpush1.bf16.msra.mxu0 %v535_v54 }
 0x1fa   : > { %615 = vmatprep.subr.bf16.mxu0 %v1230_v2 }
 0x1fc   : > { %v547_v58 = vpop.permute.xlu1 %546 }
 0x1fd   : > { %616 = vmatpush1.bf16.msra.mxu0 %v539_v55 }
 0x1fe   : > { %617 = vmatprep.subr.bf16.mxu0 %v1230_v2 }
 0x201   : > { %618 = vmatpush1.bf16.msra.mxu0 %v541_v56 }
 0x202   : > { %619 = vmatprep.subr.bf16.mxu0 %v1230_v2 }
 0x205   : > { %620 = vmatpush1.bf16.msra.mxu0 %v545_v57  ;;  %v561_v0 = vpop.permute.xlu0 %560 }
 0x206   : > { %621 = vmatprep.subr.bf16.mxu0 %v1230_v2 }
 0x209   : > { %622 = vmatpush1.bf16.msra.mxu0 %v547_v58  ;;  %v576_v21 = vpop.permute.xlu0 %575 }
 0x20c   : > { %636 = vmatmul.mubr.bf16.vlgmr.msra.gmra.mrb[0].mxu0 %v1163_v59 }
 0x20d   : > { %1065 = vmatprep.mubr.msk.bf16.mxu0 %vm596_vm6, %v1166_v60  ;;  %v566_v5 = vpop.permute.xlu1 %565 }
 0x211   : > { %v571_v16 = vpop.permute.xlu1 %570 }
 0x214   : > { %644 = vmatmul.mubr.bf16.gmra.mrb[4].mxu0 %v1168_v61 }
 0x2df   : > { %v637_v4 = vpop.f32.mrb[0].mxu0 }
 0x2e0   : > { %v638_v6 = vadd.f32 %v637_v4, %v561_v0  ;;  %v639_v7 = vpop.f32.mrb[1].mxu0 }
 0x2e1   : > { %v640_v8 = vpop.f32.mrb[2].mxu0 }
 0x2e2   : > { %v652_v10 = vmax.f32 %v638_v6, 0.0  ;;  %v641_v11 = vadd.f32 %v640_v8, %v566_v5  ;;  %v642_v12 = vpop.f32.mrb[3].mxu0 }
 0x2e4   : > { %v653_v13 = vmax.f32 %v641_v11, 0.0  ;;  %v662_v14 = vmul.f32 %v1414_v9, %v652_v10 }
 0x2e6   : > { %v663_v15 = vmul.f32 %v1414_v9, %v653_v13 }
 0x2e7   : > { %v645_v17 = vpop.f32.mrb[4].mxu0 }
 0x2e8   : > { %v646_v18 = vadd.f32 %v645_v17, %v571_v16  ;;  %v647_v19 = vpop.f32.mrb[5].mxu0  ;;  %v666_v20 = vpack.c.bf16 %v663_v15, %v662_v14 }
 0x2e9   : > { %v648_v22 = vpop.f32.mrb[6].mxu0  ;;  %v830_v19 = vld [vmem:[%s1534_s5] sm:$0xff] (!%p1080_p6) }
 0x2ea   : > { %v654_v23 = vmax.f32 %v646_v18, 0.0  ;;  %v649_v24 = vadd.f32 %v648_v22, %v576_v21  ;;  %v650_v25 = vpop.f32.mrb[7].mxu0  ;;  %670 = vrot.lane.b32.xlu1 %v666_v20, %s1232_s23  ;;  %v872_v20 = vld [vmem:[%s1536_s7] sm:$0xff] (!%p1080_p6)  ;;  %v873_v21 = vld [vmem:[%s1536_s7 + $0x8] sm:$0xff] (!%p1080_p6)  ;;  %v1238_v22 = vmov (!%p1080_p6), 0.0|0.0  }
 0x2eb   : > { %1110 = vmatprep.subr.bf16.mxu0 (!%p1080_p6), %v1238_v22  ;;  %v874_v25 = vld [vmem:[%s1536_s7 + $0x10] sm:$0xff] (!%p1080_p6) }
 0x2ec   : > { %v655_v1 = vmax.f32 %v649_v24, 0.0  ;;  %v664_v26 = vmul.f32 %v1414_v9, %v654_v23  ;;  %v1111_v23 = vpack.c.bf16 (!%p1080_p6), %v873_v21, %v872_v20  ;;  %v1240_v24 = vmov (!%p1080_p6), 0.0  }
 0x2ed   : > { %1107 = vmatprep.mubr.msk.f32.mxu0 (!%p1080_p6), %vm1239_vm8, %v1240_v24 }
 0x2ee   : > { %v665_v27 = vmul.f32 %v1414_v9, %v655_v1  ;;  %1112 = vmatpush3.bf16.msra.mxu0 (!%p1080_p6), %v1111_v23  ;;  %v875_v1 = vld [vmem:[#allocation4] sm:$0x1] (!%p1080_p6) }
 0x2ef   : > { %1105 = vmatprep.subr.mxu0 (!%p1080_p6), %v1240_v24 }
 0x2f0   : > { %v667_v28 = vpack.c.bf16 %v665_v27, %v664_v26  ;;  %v1241_v26 = vmov (!%p1080_p6), 0  }
 0x2f2   : > { %672 = vrot.lane.b32.xlu0 %v667_v28, %s1232_s23  ;;  %1106 = vmatpush3.msra.mxu0 (!%p1080_p6), %v874_v25 }
 0x35c   : > { %v671_v29 = vpop.permute.xlu1 %670 }
 0x35d   : > { %676 = vst.msk [vmem:[#allocation3] sm:$0xff] %vm519_vm5, %v671_v29 }
 0x364   : > { %v673_v30 = vpop.permute.xlu0 %672  ;;  %v678_v31 = vld [vmem:[#allocation3] sm:$0xff] }
 0x365   : > { %677 = vst.msk [vmem:[#allocation3 + $0x8] sm:$0xff] %vm519_vm5, %v673_v30  ;;  %682 = vrot.lane.b32.xlu1 %v678_v31, %s1234_s26  ;;  %761 = vmatpush1.bf16.msra.mxu1 %v678_v31 }
 0x366   : > { %762 = vmatprep.subr.bf16.mxu1 %v1230_v2 }
 0x369   : > { %688 = vrot.lane.b32.xlu1 %v678_v31, %s1233_s25 }
 0x36c   : > { %v679_v35 = vld [vmem:[#allocation3 + $0x8] sm:$0xff] }
 0x36d   : > { %694 = vrot.lane.b32.xlu1 %v678_v31, %s1235_s27  ;;  %684 = vrot.lane.b32.xlu0 %v679_v35, %s1234_s26 }
 0x36e   : > { %763 = vmatpush1.bf16.msra.mxu1 %v679_v35 }
 0x36f   : > { %764 = vmatprep.subr.bf16.mxu1 %v1230_v2 }
 0x371   : > { %700 = vrot.lane.b32.xlu1 %v678_v31, %s1236_s28  ;;  %690 = vrot.lane.b32.xlu0 %v679_v35, %s1233_s25 }
 0x375   : > { %718 = vperm.xlu1 %1162, %v1070_v36   ;;  %696 = vrot.lane.b32.xlu0 %v679_v35, %s1235_s27 }
 0x379   : > { %728 = vperm.xlu1 %1162, %v1072_v38   ;;  %702 = vrot.lane.b32.xlu0 %v679_v35, %s1236_s28 }
 0x37d   : > { %723 = vperm.xlu0 %1161, %v1071_v40  }
 0x381   : > { %733 = vperm.xlu0 %1161, %v1073_v41  }
 0x385   : > { %838 = vrot.lane.b32.xlu0 (!%p1080_p6), %v830_v19, %s1237_s10 }
 0x386   : > { %1175 = vset.pattern.permute.xlu0 (!%p1080_p6), %v1241_v26 }
 0x3d7   : > { %v683_v42 = vpop.permute.xlu1 %682 }
 0x3d8   : > { %765 = vmatpush1.bf16.msra.mxu1 %v683_v42 }
 0x3d9   : > { %766 = vmatprep.subr.bf16.mxu1 %v1230_v2 }
 0x3db   : > { %v689_v44 = vpop.permute.xlu1 %688 }
 0x3df   : > { %v685_v43 = vpop.permute.xlu0 %684  ;;  %v695_v46 = vpop.permute.xlu1 %694 }
 0x3e0   : > { %767 = vmatpush1.bf16.msra.mxu1 %v685_v43 }
 0x3e1   : > { %768 = vmatprep.subr.bf16.mxu1 %v1230_v2 }
 0x3e3   : > { %v691_v45 = vpop.permute.xlu0 %690  ;;  %v701_v48 = vpop.permute.xlu1 %700 }
 0x3e4   : > { %769 = vmatpush1.bf16.msra.mxu1 %v689_v44 }
 0x3e5   : > { %770 = vmatprep.subr.bf16.mxu1 %v1230_v2 }
 0x3e7   : > { %v697_v47 = vpop.permute.xlu0 %696 }
 0x3e8   : > { %771 = vmatpush1.bf16.msra.mxu1 %v691_v45 }
 0x3e9   : > { %772 = vmatprep.subr.bf16.mxu1 %v1230_v2 }
 0x3eb   : > { %v703_v49 = vpop.permute.xlu0 %702 }
 0x3ec   : > { %773 = vmatpush1.bf16.msra.mxu1 %v695_v46 }
 0x3ed   : > { %774 = vmatprep.subr.bf16.mxu1 %v1230_v2 }
 0x3f0   : > { %775 = vmatpush1.bf16.msra.mxu1 %v697_v47 }
 0x3f1   : > { %776 = vmatprep.subr.bf16.mxu1 %v1230_v2 }
 0x3f4   : > { %777 = vmatpush1.bf16.msra.mxu1 %v701_v48  ;;  %v719_v53 = vpop.permute.xlu1 %718 }
 0x3f5   : > { %778 = vmatprep.subr.bf16.mxu1 %v1230_v2 }
 0x3f8   : > { %779 = vmatpush1.bf16.msra.mxu1 %v703_v49  ;;  %v729_v5 = vpop.permute.xlu1 %728 }
 0x3fb   : > { %793 = vmatmul.mubr.bf16.vlgmr.msra.gmra.mrb[0].mxu1 %v1169_v50 }
 0x3fc   : > { %1079 = vmatprep.mubr.msk.bf16.mxu1 %vm596_vm6, %v1172_v51  ;;  %v724_v57 = vpop.permute.xlu0 %723 }
 0x400   : > { %v734_v11 = vpop.permute.xlu0 %733 }
 0x403   : > { %801 = vmatmul.mubr.bf16.gmra.mrb[4].mxu1 %v1174_v52 }
 0x404   : > { %v839_v27 = vpop.permute.xlu0 (!%p1080_p6), %838 }
 0x405   : > { %v851_v29 = vsel (!%p1080_p6), %vm850_vm9, %v830_v19, %v839_v27 }
 0x4ce   : > { %v794_v54 = vpop.f32.mrb[0].mxu1 }
 0x4cf   : > { %v795_v55 = vadd.f32 %v794_v54, %v719_v53  ;;  %v796_v56 = vpop.f32.mrb[1].mxu1 }
 0x4d0   : > { %v797_v58 = vpop.f32.mrb[2].mxu1 }
 0x4d1   : > { %v809_v59 = vmul.f32 %v795_v55, %v1414_v9  ;;  %v798_v60 = vadd.f32 %v797_v58, %v724_v57  ;;  %v799_v61 = vpop.f32.mrb[3].mxu1 }
 0x4d3   : > { %v813_v2 = vmul.f32 0.3, %v809_v59  ;;  %v810_v62 = vmul.f32 %v798_v60, %v1414_v9 }
 0x4d5   : > { %v817_v0 = vadd.f32 %v813_v2, %v1361_v32  ;;  %v814_v4 = vmul.f32 0.3, %v810_v62 }
 0x4d6   : > { %v802_v6 = vpop.f32.mrb[4].mxu1 }
 0x4d7   : > { %822 = vst.msk [vmem:[#allocation2] sm:$0xff] %vm821_vm7, %v817_v0  ;;  %v818_v7 = vadd.f32 %v814_v4, %v1363_v33  ;;  %v803_v8 = vadd.f32 %v802_v6, %v729_v5  ;;  %v804_v10 = vpop.f32.mrb[5].mxu1  ;;  %v855_v31 = vmul.f32 (!%p1080_p6), %v851_v29, %v817_v0 }
 0x4d8   : > { %v805_v12 = vpop.f32.mrb[6].mxu1 }
 0x4d9   : > { %823 = vst.msk [vmem:[#allocation2 + $0x8] sm:$0xff] %vm821_vm7, %v818_v7  ;;  %v811_v13 = vmul.f32 %v803_v8, %v1414_v9  ;;  %v806_v14 = vadd.f32 %v805_v12, %v734_v11  ;;  %v807_v15 = vpop.f32.mrb[7].mxu1  ;;  %v859_v43 = vsel (!%p1080_p6), %vm821_vm7, %v855_v31, 0.0 }
 0x4db   : > { %v815_v16 = vmul.f32 0.3, %v811_v13  ;;  %v812_v32 = vmul.f32 %v806_v14, %v1414_v9  ;;  %829 = sbr.rel (%p1080_p6) target bundleno = 1598 (0x63e), region = 64  ;;  %v832_v9 = vld [vmem:[%s1534_s5 + $0x10] sm:$0xff] (!%p1080_p6) }
 0x4dc   : > { %842 = vrot.lane.b32.xlu1 (!%p1080_p6), %v832_v9, %s1237_s10 }
 0x4dd   : > { %v819_v17 = vadd.f32 %v815_v16, %v1365_v34  ;;  %v816_v18 = vmul.f32 0.3, %v812_v32  ;;  %v831_v34 = vld [vmem:[%s1534_s5 + $0x8] sm:$0xff] (!%p1080_p6) }
 0x4de   : > { %840 = vrot.lane.b32.xlu0 (!%p1080_p6), %v831_v34, %s1237_s10 }
 0x4df   : > { %824 = vst.msk [vmem:[#allocation2 + $0x10] sm:$0xff] %vm821_vm7, %v819_v17  ;;  %v820_v33 = vadd.f32 %v816_v18, %v1371_v37  ;;  %v833_v37 = vld [vmem:[%s1534_s5 + $0x18] sm:$0xff] (!%p1080_p6) }
 0x4e0   : > { %844 = vrot.lane.b32.xlu1 (!%p1080_p6), %v833_v37, %s1237_s10 }
 0x4e1   : > { %825 = vst.msk [vmem:[#allocation2 + $0x18] sm:$0xff] %vm821_vm7, %v820_v33 }
 0x4e2   : > { %878 = vperm.xlu0 %1175, %v875_v1  }
 0x54e   : > { %v843_v28 = vpop.permute.xlu1 %842 }
 0x54f   : > { %v853_v30 = vsel %vm850_vm9, %v832_v9, %v843_v28 }
 0x550   : > { %v841_v35 = vpop.permute.xlu0 %840  ;;  %v857_v40 = vmul.f32 %v853_v30, %v819_v17 }
 0x551   : > { %v852_v38 = vsel %vm850_vm9, %v831_v34, %v841_v35 }
 0x552   : > { %v845_v36 = vpop.permute.xlu1 %844  ;;  %v856_v41 = vmul.f32 %v852_v38, %v818_v7  ;;  %v862_v46 = vsel %vm821_vm7, %v857_v40, 0.0 }
 0x553   : > { %v854_v39 = vsel %vm850_vm9, %v833_v37, %v845_v36 }
 0x554   : > { %v858_v42 = vmul.f32 %v854_v39, %v820_v33  ;;  %v860_v44 = vsel %vm821_vm7, %v856_v41, 0.0 }
 0x555   : > { %v861_v45 = vadd.f32 %v860_v44, %v859_v43 }
 0x556   : > { %v864_v47 = vsel %vm821_vm7, %v858_v42, 0.0 }
 0x557   : > { %v863_v48 = vadd.f32 %v862_v46, %v861_v45 }
 0x559   : > { %v865_v49 = vadd.f32 %v864_v47, %v863_v48 }
 0x55b   : > { %v866_v50 = vrot.slane %v865_v49, 4 }
 0x55d   : > { %v867_v51 = vadd.f32 %v866_v50, %v865_v49 }
 0x55f   : > { %v868_v52 = vrot.slane %v867_v51, 2 }
 0x561   : > { %v869_v53 = vadd.f32 %v868_v52, %v867_v51  ;;  %v879_v56 = vpop.permute.xlu0 %878 }
 0x562   : > { %v884_v57 = vrot.slane %v879_v56, %v659_v3 }
 0x563   : > { %v870_v54 = vrot.slane %v869_v53, 1 }
 0x565   : > { %v871_v55 = vadd.f32 %v870_v54, %v869_v53 }
 0x567   : > { %1108 = vmatmul.mubr.msk.f32.vlgmr.msra.gmra.mrb[0].mxu0 %vm821_vm7, %v871_v55 }
 0x63a   : > { %v954_v58 = vpop.f32.mrb[0].mxu0 }
 0x63b   : > { %v955_v59 = vadd.f32 %v954_v58, %v884_v57  ;;  %v1109_v60 = vpop.f32.mrb[1].mxu0 }
 0x63d   : > { %959 = vst.msk [vmem:[#allocation5] sm:$0x1] %vm958_vm10, %v955_v59 }
 0x63e PF: > { %p1494_p7 = scmp.eq.s32.totalorder %s1046_s8, 4  ;;  %s1242_s27 = smov [#allocation5]  }
 0x63f   : > { %s969_s28 = sshll.u32 %s1242_s27, 4  ;;  %s970_s28 = int_to_ptr.vmem [resolvable:$true] %s969_s28 }
 0x640   : > { %s1176_s21 = scalar_lea.vmem %s970_s28, 16  ;;  %s1182_s24 = scalar_lea.vmem %s970_s28, 32 }
 0x641   : > { %p1177_p8 = scmp.ne.s32.totalorder %s970_s28, %s1176_s21  ;;  %p1183_p11 = scmp.lt.s32.totalorder %s970_s28, %s970_s28 }
 0x642   : > { %p1184_p12 = scmp.lt.s32.totalorder %s1182_s24, %s1176_s21 }
 0x643   : > { %p1178_p9 = pnand %p1177_p8, %p1494_p7 }
 0x644   : > { %p1185_p13 = por %p1184_p12, %p1183_p11 }
 0x645   : > { %p1179_p10 = pneg %p1178_p9 }
 0x647   : > { %p1186_p0 = pnand %p1185_p13, %p1179_p10 }
 0x649   : > { %1189 = shalt.err (!%p1186_p0)
}
 0x64a   : > { %s1190_s30 = scalar_lea.hbm %s1538_s9, 16 }
 0x64b   : > { %p1191_p1 = scmp.ne.s32.totalorder %s1538_s9, %s1190_s30  ;;  %p1196_p4 = scmp.lt.u32.totalorder %s1190_s30, %s1538_s9 }
 0x64d   : > { %p1192_p2 = pnand %p1191_p1, %p1494_p7 }
 0x64f   : > { %p1193_p3 = pneg %p1192_p2 }
 0x651   : > { %p1198_p5 = pnand %p1196_p4, %p1193_p3 }
 0x653   : > { %1201 = shalt.err (!%p1198_p5)
}
 0x654   : > { %1115 = dma.vmem_to_hbm [thread:$0]  (%p1494_p7), %s970_s28, 16, %s1538_s9, [#allocation6]  }
 0x655   : > { %1215 = dma.done.wait (%p1494_p7), [#allocation6], 16  }
 0x656   : > { %1217 = vsyncadd (%p1494_p7), [#allocation6], 4294967280 }
 0x657 PF: > { %s22_s13 = sadd.s32 1, %s1228_s13   ;;  %s1540_s11 = smov %s1224_s12 }
 0x658   : > { %p19_p6 = scmp.ge.s32.totalorder %s22_s13, 7   ;;  %s1541_s12 = smov %s1543_s14 }
 0x65a   :  { %21 = sbr.rel (!%p19_p6) target bundleno = 5 (0x5), region = 100 }
 0x661   :  { %982 = vsyncpa [#allocation6], 1 }
 0x662   :  { %984 = vsyncpa [#allocation6 + $0x1], 1 }

</bundles_post_ra>
